<compile_context>
chip_gen: v7x
topology: tpu7x:2x2x1
jax: 0.10.0
libtpu: 0.0.40
codegen_flags: <defaults>
</compile_context>

<pallas_src>
import jax
import jax.numpy as jnp
from jax.experimental import pallas as pl
from jax.experimental.pallas import tpu as pltpu

# ---------------------------------------------------------------------------
# Small, TPU-friendly stand-in sizes (for in_features_effnet=1408, in_features_vit=768)
# ---------------------------------------------------------------------------
B = 2              # batch
H = W = 16         # spatial
C = 3              # channels (RGB)
PATCH = 8          # patch size for both stand-in stems
P = (H // PATCH) * (W // PATCH)          # patches per image = 4
BP = B * P                               # total patch rows = 8
K = PATCH * PATCH * C                    # flattened patch dim = 192
D_EFF = 128        # stand-in EfficientNet-B2 feature dim (vreg lane boundary)
D_VIT = 128        # stand-in ViT-B/16 feature dim
D_TOTAL = D_EFF + D_VIT                  # 256
NUM_CLASSES = 7
BN_EPS = 1e-5      # nn.BatchNorm1d default eps

USE_BF16_WEIGHTS = False   # optional: halve weight HBM traffic (small deviation from f32 ref)

_VMEM = pl.BlockSpec(memory_space=pltpu.MemorySpace.VMEM)  # whole-array-in-VMEM spec


# ---------------------------------------------------------------------------
# Fused kernel: merged patch-embed matmul -> lane-aligned relu/tanh -> head matmul
#               -> patch-mean pooling matmul (+bias), all 2D, all VMEM-resident.
# ---------------------------------------------------------------------------
def ensemble_kernel(patches_ref, w_ref, bias_ref, fcw_ref, fcb_ref, pool_ref, o_ref):
    # Merged patch-embed: (B*P, K) @ (K, D_TOTAL) on the MXU, f32 accumulate.
    h = jnp.dot(patches_ref[...].astype(w_ref.dtype), w_ref[...],
                preferred_element_type=jnp.float32)
    h = h + bias_ref[...]                                   # (B*P, D_TOTAL), bias pre-tiled

    # Per-branch nonlinearity via static lane-aligned slices (no iota / select):
    # ReLU on the effnet lanes [0:128], tanh on the vit lanes [128:256].
    h_eff = jnp.maximum(h[:, :D_EFF], 0.0)
    h_vit = jnp.tanh(h[:, D_EFF:])
    h = jnp.concatenate([h_eff, h_vit], axis=1)             # lane-aligned, stays in 2 vregs/row

    # Head (BatchNorm1d eval folded into fcw/fcb; Dropout eval = identity):
    # apply per patch first (mean is linear), then pool.
    y = jnp.dot(h.astype(fcw_ref.dtype), fcw_ref[...],
                preferred_element_type=jnp.float32)          # (B*P, NUM_CLASSES)

    # Patch-mean pooling as a tiny (B, B*P) @ (B*P, NUM_CLASSES) MXU matmul
    # (1/P already folded into pool_ref), plus the folded bias.
    o_ref[...] = jnp.dot(pool_ref[...], y,
                         preferred_element_type=jnp.float32) + fcb_ref[...]


# ---------------------------------------------------------------------------
# Wrappers
# ---------------------------------------------------------------------------
def _patchify(x_nhwc):
    """(B, H, W, C) -> (B*P, PATCH*PATCH*C) non-overlapping patches (glue reshape)."""
    b, h, w, c = x_nhwc.shape
    x = x_nhwc.reshape(b, h // PATCH, PATCH, w // PATCH, PATCH, c)
    x = x.transpose(0, 1, 3, 2, 4, 5)
    return x.reshape(b * (h // PATCH) * (w // PATCH), PATCH * PATCH * c)


def prepare_fused_params(params):
    """ONE-TIME parameter fusion (hoisted out of the per-call forward):
       * merge the two patch-embed weights into one (K, D_TOTAL) weight,
       * pre-tile the merged bias to (B*P, D_TOTAL),
       * fold eval-mode BatchNorm1d into the Linear head,
       * build the (B, B*P) patch-mean pooling matrix with 1/P folded in."""
    w_merged = jnp.concatenate([params["eff_w"], params["vit_w"]], axis=1)        # (K, 256)

    eff_bias = jnp.broadcast_to(params["eff_b"].reshape(1, D_EFF), (P, D_EFF))    # (P, 128)
    vit_bias = params["vit_pos"].reshape(P, D_VIT)                                # (P, 128)
    bias_merged = jnp.concatenate([eff_bias, vit_bias], axis=1)                   # (P, 256)
    bias_tiled = jnp.tile(bias_merged, (B, 1))                                    # (B*P, 256)

    # BN fold (eval mode): y = ((x - mean) * rsqrt(var+eps) * gamma + beta) @ W + b
    #                        =  x @ (scale[:,None] * W) + (b + (beta - mean*scale) @ W)
    scale = params["bn_gamma"] * jax.lax.rsqrt(params["bn_var"] + BN_EPS)         # (1, 256)
    fc_w = scale.reshape(D_TOTAL, 1) * params["fc_w"]                             # (256, 7)
    fc_b = params["fc_b"] + jnp.dot(params["bn_beta"] - params["bn_mean"] * scale,
                                    params["fc_w"])                               # (1, 7)

    # Pooling matrix: pool[b, b*P + p] = 1/P, else 0.
    pool = jnp.kron(jnp.eye(B, dtype=jnp.float32),
                    jnp.full((1, P), 1.0 / P, jnp.float32))                       # (B, B*P)

    w_dtype = jnp.bfloat16 if USE_BF16_WEIGHTS else jnp.float32
    return {
        "w": w_merged.astype(w_dtype),
        "bias": bias_tiled.astype(jnp.float32),
        "fc_w": fc_w.astype(w_dtype),
        "fc_b": fc_b.astype(jnp.float32),
        "pool": pool,
    }


def emotion_ensemble_forward(x_nchw, fused):
    """Forward pass of EmotionEnsemble (eval mode). x_nchw: (B, C, H, W) float32.
       `fused` must come from prepare_fused_params (computed once, outside jit)."""
    x_nhwc = jnp.transpose(x_nchw, (0, 2, 3, 1))    # NCHW -> NHWC
    patches = _patchify(x_nhwc)                     # (B*P, K)

    return pl.pallas_call(
        ensemble_kernel,
        out_shape=jax.ShapeDtypeStruct((B, NUM_CLASSES), jnp.float32),
        in_specs=[_VMEM] * 6,
        out_specs=_VMEM,
    )(patches, fused["w"], fused["bias"], fused["fc_w"], fused["fc_b"], fused["pool"])


def init_params(key):
    """Deterministic parameter init (mirrors the shapes implied by __init__)."""
    keys = jax.random.split(key, 6)
    return {
        # stand-in EfficientNet stem / projection
        "eff_w": jax.random.normal(keys[0], (K, D_EFF), jnp.float32) * 0.05,
        "eff_b": jax.random.normal(keys[1], (1, 1, D_EFF), jnp.float32) * 0.01,
        # stand-in ViT patch embedding + positional embedding
        "vit_w": jax.random.normal(keys[2], (K, D_VIT), jnp.float32) * 0.05,
        "vit_pos": jax.random.normal(keys[3], (1, P, D_VIT), jnp.float32) * 0.02,
        # BatchNorm1d(D_TOTAL) default init: weight=1, bias=0, running stats (0, 1)
        "bn_gamma": jnp.ones((1, D_TOTAL), jnp.float32),
        "bn_beta": jnp.zeros((1, D_TOTAL), jnp.float32),
        "bn_mean": jnp.zeros((1, D_TOTAL), jnp.float32),
        "bn_var": jnp.ones((1, D_TOTAL), jnp.float32),
        # Linear(D_TOTAL, NUM_CLASSES) stored (in, out); transpose PyTorch weights on load.
        "fc_w": jax.random.normal(keys[4], (D_TOTAL, NUM_CLASSES), jnp.float32)
                * (1.0 / jnp.sqrt(D_TOTAL)),
        "fc_b": jax.random.normal(keys[5], (1, NUM_CLASSES), jnp.float32) * 0.01,
    }


if __name__ == "__main__":
    key = jax.random.PRNGKey(0)
    k_x, k_p = jax.random.split(key)
    x = jax.random.normal(k_x, (B, C, H, W), jnp.float32)   # NCHW, like the PyTorch module
    params = init_params(k_p)

    # One-time parameter fusion, outside the jit'd per-call forward.
    fused = jax.tree_util.tree_map(jax.block_until_ready, prepare_fused_params(params))

    fwd = jax.jit(emotion_ensemble_forward)
    out = jax.block_until_ready(fwd(x, fused))

    assert out.shape == (B, NUM_CLASSES), out.shape
    assert out.dtype == jnp.float32
    assert bool(jnp.all(jnp.isfinite(out)))
    print("KERNEL_OK")
</pallas_src>

<mosaic_0001>
module attributes {stable_mosaic.version = 11 : i64} {
  func.func @ensemble_kernel(%arg0: memref<8x192xf32, #tpu.memory_space<vmem>>, %arg1: memref<192x256xf32, #tpu.memory_space<vmem>>, %arg2: memref<8x256xf32, #tpu.memory_space<vmem>>, %arg3: memref<256x7xf32, #tpu.memory_space<vmem>>, %arg4: memref<1x7xf32, #tpu.memory_space<vmem>>, %arg5: memref<2x8xf32, #tpu.memory_space<vmem>>, %arg6: memref<2x7xf32, #tpu.memory_space<vmem>>) attributes {dimension_semantics = [], scalar_prefetch = 0 : i64, scratch_operands = 0 : i64, tpu.core_type = #tpu.core_type<tc>} {
    %c0 = arith.constant 0 : index
    %c0_0 = arith.constant 0 : index
    %0 = vector.load %arg0[%c0, %c0_0] : memref<8x192xf32, #tpu.memory_space<vmem>>, vector<8x192xf32>
    %c0_1 = arith.constant 0 : index
    %c0_2 = arith.constant 0 : index
    %1 = vector.load %arg1[%c0_1, %c0_2] : memref<192x256xf32, #tpu.memory_space<vmem>>, vector<192x256xf32>
    %cst = arith.constant dense<0.000000e+00> : vector<8x256xf32>
    %2 = tpu.matmul %0, %1, %cst {dimension_numbers = #tpu.dot_dimension_numbers<[1], [0], [0], [1], [0, 0, 1, 1], [], []>} : vector<8x192xf32>, vector<192x256xf32>, vector<8x256xf32> -> vector<8x256xf32>
    %c0_3 = arith.constant 0 : index
    %c0_4 = arith.constant 0 : index
    %3 = vector.load %arg2[%c0_3, %c0_4] : memref<8x256xf32, #tpu.memory_space<vmem>>, vector<8x256xf32>
    %4 = arith.addf %2, %3 : vector<8x256xf32>
    %5 = vector.extract_strided_slice %4 {offsets = [0, 0], sizes = [8, 128], strides = [1, 1]} : vector<8x256xf32> to vector<8x128xf32>
    %cst_5 = arith.constant 0.000000e+00 : f32
    %6 = vector.broadcast %cst_5 : f32 to vector<8x128xf32>
    %7 = arith.maximumf %5, %6 : vector<8x128xf32>
    %8 = vector.extract_strided_slice %4 {offsets = [0, 128], sizes = [8, 128], strides = [1, 1]} : vector<8x256xf32> to vector<8x128xf32>
    %9 = math.tanh %8 : vector<8x128xf32>
    %10 = tpu.concatenate %7, %9 in 1 : vector<8x128xf32>, vector<8x128xf32> -> vector<8x256xf32>
    %c0_6 = arith.constant 0 : index
    %c0_7 = arith.constant 0 : index
    %11 = vector.load %arg3[%c0_6, %c0_7] : memref<256x7xf32, #tpu.memory_space<vmem>>, vector<256x7xf32>
    %cst_8 = arith.constant dense<0.000000e+00> : vector<8x7xf32>
    %12 = tpu.matmul %10, %11, %cst_8 {dimension_numbers = #tpu.dot_dimension_numbers<[1], [0], [0], [1], [0, 0, 1, 1], [], []>} : vector<8x256xf32>, vector<256x7xf32>, vector<8x7xf32> -> vector<8x7xf32>
    %c0_9 = arith.constant 0 : index
    %c0_10 = arith.constant 0 : index
    %13 = vector.load %arg5[%c0_9, %c0_10] : memref<2x8xf32, #tpu.memory_space<vmem>>, vector<2x8xf32>
    %cst_11 = arith.constant dense<0.000000e+00> : vector<2x7xf32>
    %14 = tpu.matmul %13, %12, %cst_11 {dimension_numbers = #tpu.dot_dimension_numbers<[1], [0], [0], [1], [0, 0, 1, 1], [], []>} : vector<2x8xf32>, vector<8x7xf32>, vector<2x7xf32> -> vector<2x7xf32>
    %c0_12 = arith.constant 0 : index
    %c0_13 = arith.constant 0 : index
    %15 = vector.load %arg4[%c0_12, %c0_13] : memref<1x7xf32, #tpu.memory_space<vmem>>, vector<1x7xf32>
    %16 = vector.broadcast %15 : vector<1x7xf32> to vector<2x7xf32>
    %17 = arith.addf %14, %16 : vector<2x7xf32>
    %c0_14 = arith.constant 0 : index
    %c0_15 = arith.constant 0 : index
    %18 = vector.load %arg6[%c0_14, %c0_15] : memref<2x7xf32, #tpu.memory_space<vmem>>, vector<2x7xf32>
    tpu.vector_store %arg6[%c0_14, %c0_15], %17 {strides = array<i32>} : memref<2x7xf32, #tpu.memory_space<vmem>>, vector<2x7xf32>,
    return
  }
}

</mosaic_0001>

<bundles_post_ra>
// kernel: emotion_ensemble_forward.1
= control target key start
LH: loop header
LB: loop body
LE: loop exit
PB: predicated region body
PF: predicated region fallthrough
CT: control target
= control target key end

     0   :  { %vm76_vm0 = vcmask 523264   ;;  %s815_s0 = inlined_call_operand.vmem [shape: f32[8,192], index: 0, kind: input, shape index: {}]   ;;  %s816_s1 = inlined_call_operand.vmem [shape: f32[192,256], index: 1, kind: input, shape index: {}]   ;;  %s817_s2 = inlined_call_operand.vmem [shape: f32[8,256], index: 2, kind: input, shape index: {}]   ;;  %s818_s3 = inlined_call_operand.vmem [shape: f32[256,7], index: 3, kind: input, shape index: {}]   ;;  %s819_s4 = inlined_call_operand.vmem [shape: f32[1,7], index: 4, kind: input, shape index: {}]   ;;  %s820_s5 = inlined_call_operand.vmem [shape: f32[2,8], index: 5, kind: input, shape index: {}]   ;;  %s821_s6 = inlined_call_operand.hbm [shape: f32[2,7], index: 6, kind: output, shape index: {}]  }
   0x1   :  { %v27_v0 = vld [vmem:[%s816_s1 + $0x8] sm:$0xff]  ;;  %v29_v1 = vld [vmem:[%s816_s1 + $0x18] sm:$0xff]  ;;  %v26_v2 = vld [vmem:[%s816_s1] sm:$0xff] }
   0x2   :  { %v398_v3 = vpack.c.bf16 %v29_v1, %v27_v0  ;;  %v28_v4 = vld [vmem:[%s816_s1 + $0x10] sm:$0xff]  ;;  %v31_v5 = vld [vmem:[%s816_s1 + $0x28] sm:$0xff]  ;;  %v33_v6 = vld [vmem:[%s816_s1 + $0x38] sm:$0xff] }
   0x3   :  { %v400_v7 = vpack.c.bf16 %v28_v4, %v26_v2  ;;  %v402_v8 = vpack.c.bf16 %v33_v6, %v31_v5  ;;  %v30_v9 = vld [vmem:[%s816_s1 + $0x20] sm:$0xff]  ;;  %v32_v10 = vld [vmem:[%s816_s1 + $0x30] sm:$0xff]  ;;  %v35_v11 = vld [vmem:[%s816_s1 + $0x48] sm:$0xff] }
   0x4   :  { %399 = vmatprep.subr.bf16.mxu0 %v398_v3  ;;  %v37_v12 = vld [vmem:[%s816_s1 + $0x58] sm:$0xff]  ;;  %v404_v13 = vpack.c.bf16 %v32_v10, %v30_v9  ;;  %v34_v15 = vld [vmem:[%s816_s1 + $0x40] sm:$0xff]  ;;  %v36_v16 = vld [vmem:[%s816_s1 + $0x50] sm:$0xff] }
   0x5   :  { %401 = vmatpush1.bf16.msra.mxu0 %v400_v7  ;;  %v406_v14 = vpack.c.bf16 %v37_v12, %v35_v11  ;;  %v39_v17 = vld [vmem:[%s816_s1 + $0x68] sm:$0xff]  ;;  %v41_v18 = vld [vmem:[%s816_s1 + $0x78] sm:$0xff]  ;;  %v408_v19 = vpack.c.bf16 %v36_v16, %v34_v15  ;;  %v38_v21 = vld [vmem:[%s816_s1 + $0x60] sm:$0xff] }
   0x6   :  { %403 = vmatprep.subr.bf16.mxu0 %v402_v8  ;;  %v410_v20 = vpack.c.bf16 %v41_v18, %v39_v17  ;;  %v40_v22 = vld [vmem:[%s816_s1 + $0x70] sm:$0xff]  ;;  %v43_v23 = vld [vmem:[%s816_s1 + $0x88] sm:$0xff]  ;;  %v45_v24 = vld [vmem:[%s816_s1 + $0x98] sm:$0xff] }
   0x7   :  { %v412_v25 = vpack.c.bf16 %v40_v22, %v38_v21  ;;  %v414_v26 = vpack.c.bf16 %v45_v24, %v43_v23  ;;  %v42_v27 = vld [vmem:[%s816_s1 + $0x80] sm:$0xff]  ;;  %v44_v28 = vld [vmem:[%s816_s1 + $0x90] sm:$0xff]  ;;  %v47_v29 = vld [vmem:[%s816_s1 + $0xa8] sm:$0xff] }
   0x8   :  { %v49_v30 = vld [vmem:[%s816_s1 + $0xb8] sm:$0xff]  ;;  %v46_v31 = vld [vmem:[%s816_s1 + $0xa0] sm:$0xff]  ;;  %v48_v32 = vld [vmem:[%s816_s1 + $0xb0] sm:$0xff]  ;;  %v416_v33 = vpack.c.bf16 %v44_v28, %v42_v27 }
   0x9   :  { %405 = vmatpush1.bf16.msra.mxu0 %v404_v13  ;;  %v51_v34 = vld [vmem:[%s816_s1 + $0xc8] sm:$0xff]  ;;  %v53_v35 = vld [vmem:[%s816_s1 + $0xd8] sm:$0xff]  ;;  %v169_v37 = vld [vmem:[%s818_s3 + $0x80] sm:$0xff]  ;;  %v418_v38 = vpack.c.bf16 %v49_v30, %v47_v29  ;;  %v420_v51 = vpack.c.bf16 %v48_v32, %v46_v31 }
   0xa   :  { %407 = vmatprep.subr.bf16.mxu0 %v406_v14  ;;  %v25_v36 = vld [vmem:[%s815_s0 + $0x8] sm:$0xff]  ;;  %v153_v40 = vld [vmem:[%s818_s3] sm:$0xff]  ;;  %v171_v44 = vld [vmem:[%s818_s3 + $0x90] sm:$0xff]  ;;  %v422_v53 = vpack.c.bf16 %v53_v35, %v51_v34 }
   0xb   :  { %353 = vmatprep.mubr.msk.f32.mxu0 %vm76_vm0, %v25_v36  ;;  %v170_v39 = vld [vmem:[%s818_s3 + $0x88] sm:$0xff]  ;;  %v172_v45 = vld [vmem:[%s818_s3 + $0x98] sm:$0xff]  ;;  %v155_v46 = vld [vmem:[%s818_s3 + $0x10] sm:$0xff] }
   0xc   :  { %v154_v41 = vld [vmem:[%s818_s3 + $0x8] sm:$0xff]  ;;  %v446_v42 = vpack.c.bf16 %v170_v39, %v169_v37  ;;  %v450_v47 = vpack.c.bf16 %v172_v45, %v171_v44  ;;  %v156_v48 = vld [vmem:[%s818_s3 + $0x18] sm:$0xff]  ;;  %v173_v49 = vld [vmem:[%s818_s3 + $0xa0] sm:$0xff] }
   0xd   :  { %409 = vmatpush1.bf16.msra.mxu0 %v408_v19  ;;  %v448_v43 = vpack.c.bf16 %v154_v41, %v153_v40  ;;  %v174_v50 = vld [vmem:[%s818_s3 + $0xa8] sm:$0xff]  ;;  %v50_v52 = vld [vmem:[%s816_s1 + $0xc0] sm:$0xff]  ;;  %v52_v54 = vld [vmem:[%s816_s1 + $0xd0] sm:$0xff]  ;;  %v452_v57 = vpack.c.bf16 %v156_v48, %v155_v46 }
   0xe   :  { %411 = vmatprep.subr.bf16.mxu0 %v410_v20  ;;  %447 = vmatprep.subr.bf16.mxu1 %v446_v42  ;;  %v55_v55 = vld [vmem:[%s816_s1 + $0xe8] sm:$0xff]  ;;  %v57_v56 = vld [vmem:[%s816_s1 + $0xf8] sm:$0xff]  ;;  %v454_v58 = vpack.c.bf16 %v174_v50, %v173_v49  ;;  %v157_v59 = vld [vmem:[%s818_s3 + $0x20] sm:$0xff] }
   0xf   :  { %449 = vmatpush3.bf16.msra.mxu1 %v448_v43  ;;  %v158_v60 = vld [vmem:[%s818_s3 + $0x28] sm:$0xff] }
  0x10   :  { %451 = vmatprep.subr.bf16.mxu1 %v450_v47 }
  0x11   :  { %413 = vmatpush1.bf16.msra.mxu0 %v412_v25 }
  0x12   :  { %415 = vmatprep.subr.bf16.mxu0 %v414_v26 }
  0x15   :  { %417 = vmatpush1.bf16.msra.mxu0 %v416_v33 }
  0x16   :  { %419 = vmatprep.subr.bf16.mxu0 %v418_v38 }
  0x17   :  { %11 = vsyncpa [#allocation3], 0  ;;  %v175_v61 = vld [vmem:[%s818_s3 + $0xb0] sm:$0xff]  ;;  %v176_v62 = vld [vmem:[%s818_s3 + $0xb8] sm:$0xff]  ;;  %v424_v63 = vpack.c.bf16 %v52_v54, %v50_v52  ;;  %v426_v0 = vpack.c.bf16 %v57_v56, %v55_v55  ;;  %453 = vmatpush3.bf16.msra.mxu1 %v452_v57  ;;  %v456_v4 = vpack.c.bf16 %v158_v60, %v157_v59  ;;  %vm508_vm1 = vmmov 0   ;;  %s509_s19 = smov [#allocation2]  }
  0x18   :  { %v54_v1 = vld [vmem:[%s816_s1 + $0xe0] sm:$0xff]  ;;  %v56_v2 = vld [vmem:[%s816_s1 + $0xf0] sm:$0xff]  ;;  %v59_v3 = vld [vmem:[%s816_s1 + $0x108] sm:$0xff]  ;;  %455 = vmatprep.subr.bf16.mxu1 %v454_v58  ;;  %v458_v6 = vpack.c.bf16 %v176_v62, %v175_v61  ;;  %vm263_vm2 = vcmask 64512   ;;  %s345_s20 = sshll.u32 %s509_s19, 4  ;;  %vm337_vm3 = vcmask 50176   ;;  %s346_s20 = int_to_ptr.vmem [resolvable:$true] %s345_s20 }
  0x19   :  { %421 = vmatpush1.bf16.msra.mxu0 %v420_v51  ;;  %v61_v5 = vld [vmem:[%s816_s1 + $0x118] sm:$0xff]  ;;  %v159_v7 = vld [vmem:[%s818_s3 + $0x30] sm:$0xff]  ;;  %v428_v9 = vpack.c.bf16 %v56_v2, %v54_v1  ;;  %v58_v11 = vld [vmem:[%s816_s1 + $0x100] sm:$0xff]  ;;  %v507_v2 = vmov 0.0   ;;  %s483_s21 = scalar_lea.vmem %s346_s20, 32  ;;  %p488_p1 = scmp.lt.s32.totalorder %s346_s20, %s346_s20 }
  0x1a   :  { %423 = vmatprep.subr.bf16.mxu0 %v422_v53  ;;  %v160_v8 = vld [vmem:[%s818_s3 + $0x38] sm:$0xff]  ;;  %v430_v10 = vpack.c.bf16 %v61_v5, %v59_v3  ;;  %v60_v12 = vld [vmem:[%s816_s1 + $0x110] sm:$0xff]  ;;  %v63_v14 = vld [vmem:[%s816_s1 + $0x128] sm:$0xff]  ;;  %p484_p0 = scmp.ne.s32.totalorder %s346_s20, %s483_s21  ;;  %p489_p2 = scmp.lt.s32.totalorder %s483_s21, %s483_s21 }
  0x1b   :  { %457 = vmatpush3.bf16.msra.mxu1 %v456_v4  ;;  %v460_v13 = vpack.c.bf16 %v160_v8, %v159_v7  ;;  %v65_v15 = vld [vmem:[%s816_s1 + $0x138] sm:$0xff]  ;;  %v432_v16 = vpack.c.bf16 %v60_v12, %v58_v11  ;;  %v62_v18 = vld [vmem:[%s816_s1 + $0x120] sm:$0xff]  ;;  %v64_v19 = vld [vmem:[%s816_s1 + $0x130] sm:$0xff] }
  0x1c   :  { %459 = vmatprep.subr.bf16.mxu1 %v458_v6  ;;  %v434_v17 = vpack.c.bf16 %v65_v15, %v63_v14  ;;  %v67_v20 = vld [vmem:[%s816_s1 + $0x148] sm:$0xff]  ;;  %v69_v21 = vld [vmem:[%s816_s1 + $0x158] sm:$0xff]  ;;  %v436_v22 = vpack.c.bf16 %v64_v19, %v62_v18  ;;  %v66_v24 = vld [vmem:[%s816_s1 + $0x140] sm:$0xff]  ;;  %p490_p3 = por %p489_p2, %p488_p1 }
  0x1d   :  { %425 = vmatpush1.bf16.msra.mxu0 %v424_v63  ;;  %v438_v23 = vpack.c.bf16 %v69_v21, %v67_v20  ;;  %v68_v25 = vld [vmem:[%s816_s1 + $0x150] sm:$0xff]  ;;  %v71_v26 = vld [vmem:[%s816_s1 + $0x168] sm:$0xff]  ;;  %v73_v27 = vld [vmem:[%s816_s1 + $0x178] sm:$0xff] }
  0x1e   :  { %427 = vmatprep.subr.bf16.mxu0 %v426_v0  ;;  %v440_v28 = vpack.c.bf16 %v68_v25, %v66_v24  ;;  %v442_v29 = vpack.c.bf16 %v73_v27, %v71_v26  ;;  %v70_v30 = vld [vmem:[%s816_s1 + $0x160] sm:$0xff]  ;;  %v72_v31 = vld [vmem:[%s816_s1 + $0x170] sm:$0xff]  ;;  %v178_v35 = vld [vmem:[%s818_s3 + $0xc8] sm:$0xff]  ;;  %p491_p4 = pnand %p490_p3, %p484_p0 }
  0x1f   :  { %461 = vmatpush3.bf16.msra.mxu1 %v460_v13  ;;  %v444_v32 = vpack.c.bf16 %v72_v31, %v70_v30  ;;  %v24_v33 = vld [vmem:[%s815_s0] sm:$0xff]  ;;  %v162_v38 = vld [vmem:[%s818_s3 + $0x48] sm:$0xff]  ;;  %v179_v40 = vld [vmem:[%s818_s3 + $0xd0] sm:$0xff] }
  0x20   :  { %v177_v34 = vld [vmem:[%s818_s3 + $0xc0] sm:$0xff]  ;;  %v180_v41 = vld [vmem:[%s818_s3 + $0xd8] sm:$0xff]  ;;  %v163_v43 = vld [vmem:[%s818_s3 + $0x50] sm:$0xff] }
  0x21   :  { %429 = vmatpush1.bf16.msra.mxu0 %v428_v9  ;;  %v462_v36 = vpack.c.bf16 %v178_v35, %v177_v34  ;;  %v161_v37 = vld [vmem:[%s818_s3 + $0x40] sm:$0xff]  ;;  %v466_v42 = vpack.c.bf16 %v180_v41, %v179_v40  ;;  %v164_v44 = vld [vmem:[%s818_s3 + $0x58] sm:$0xff]  ;;  %v182_v47 = vld [vmem:[%s818_s3 + $0xe8] sm:$0xff] }
  0x22   :  { %431 = vmatprep.subr.bf16.mxu0 %v430_v10  ;;  %v464_v39 = vpack.c.bf16 %v162_v38, %v161_v37  ;;  %v468_v45 = vpack.c.bf16 %v164_v44, %v163_v43  ;;  %v181_v46 = vld [vmem:[%s818_s3 + $0xe0] sm:$0xff]  ;;  %v166_v50 = vld [vmem:[%s818_s3 + $0x68] sm:$0xff]  ;;  %v183_v51 = vld [vmem:[%s818_s3 + $0xf0] sm:$0xff] }
  0x23   :  { %463 = vmatprep.subr.bf16.mxu1 %v462_v36  ;;  %v165_v48 = vld [vmem:[%s818_s3 + $0x60] sm:$0xff]  ;;  %v470_v49 = vpack.c.bf16 %v182_v47, %v181_v46  ;;  %v184_v52 = vld [vmem:[%s818_s3 + $0xf8] sm:$0xff]  ;;  %v167_v55 = vld [vmem:[%s818_s3 + $0x70] sm:$0xff] }
  0x24   :  { %465 = vmatpush3.bf16.msra.mxu1 %v464_v39  ;;  %v472_v53 = vpack.c.bf16 %v166_v50, %v165_v48  ;;  %v474_v54 = vpack.c.bf16 %v184_v52, %v183_v51  ;;  %v168_v56 = vld [vmem:[%s818_s3 + $0x78] sm:$0xff]  ;;  %v75_v58 = vld [vmem:[%s817_s2 + $0x8] sm:$0xff]  ;;  %v74_v62 = vld [vmem:[%s817_s2] sm:$0xff] }
  0x25   :  { %433 = vmatpush1.bf16.msra.mxu0 %v432_v16  ;;  %467 = vmatprep.subr.bf16.mxu1 %v466_v42  ;;  %v476_v57 = vpack.c.bf16 %v168_v56, %v167_v55  ;;  %v255_v6 = vld [vmem:[%s820_s5] sm:$0x3] }
  0x26   :  { %435 = vmatprep.subr.bf16.mxu0 %v434_v17  ;;  %v354_v7 = vld [vmem:[%s819_s4] ss:$0 sm:$0xff] }
  0x28   :  { %469 = vmatpush3.bf16.msra.mxu1 %v468_v45 }
  0x29   :  { %437 = vmatpush1.bf16.msra.mxu0 %v436_v22  ;;  %471 = vmatprep.subr.bf16.mxu1 %v470_v49 }
  0x2a   :  { %439 = vmatprep.subr.bf16.mxu0 %v438_v23 }
  0x2c   :  { %473 = vmatpush3.bf16.msra.mxu1 %v472_v53 }
  0x2d   :  { %441 = vmatpush1.bf16.msra.mxu0 %v440_v28  ;;  %475 = vmatprep.subr.bf16.mxu1 %v474_v54 }
  0x2e   :  { %443 = vmatprep.subr.bf16.mxu0 %v442_v29 }
  0x30   :  { %477 = vmatpush3.bf16.msra.mxu1 %v476_v57 }
  0x31   :  { %445 = vmatpush1.bf16.msra.mxu0 %v444_v32  ;;  %393 = vmatprep.subr.mxu1 %v507_v2 }
  0x34   :  { %145 = vmatmul.mubr.f32.vlgmr.msra.gmra.mrb[0].mxu0 %v24_v33 }
 0x107   :  { %v146_v59 = vpop.f32.mrb[0].mxu0 }
 0x108   :  { %v148_v60 = vpop.f32.mrb[1].mxu0  ;;  %v147_v63 = vadd.f32 %v146_v59, %v74_v62 }
 0x109   :  { %v149_v61 = vadd.f32 %v148_v60, %v75_v58 }
 0x10a   :  { %v151_v1 = vmax.f32 %v147_v63, 0.0 }
 0x10b   :  { %481 = vtanh.f32 %v149_v61 }
 0x115   :  { %v482_v0 = vpop.eup %481 }
 0x116   :  { %249 = vmatprep.mubr.f32.mxu1 %v482_v0 }
 0x117   :  { %250 = vmatmul.mubr.f32.vlgmr.msra.gmra.mrb[0].mxu1 %v151_v1 }
 0x118   :  { %395 = vmatprep.mubr.msk.f32.mxu1 %vm508_vm1, %v507_v2 }
 0x1ea   :  { %v388_v3 = vpop.f32.mrb[0].mxu1 }
 0x1eb   :  { %v389_v4 = vpop.f32.mrb[1].mxu1 }
 0x1ec   :  { %v390_v5 = vadd.f32 %v389_v4, %v388_v3 }
 0x1ee   :  { %394 = vmatpush3.msra.mxu1 %v390_v5 }
 0x1ef   :  { %396 = vmatmul.mubr.msk.f32.vlgmr.msra.gmra.mrb[2].mxu1 %vm263_vm2, %v255_v6 }
 0x2c2   :  { %v333_v8 = vpop.f32.mrb[2].mxu1 }
 0x2c3   :  { %v334_v9 = vadd.f32 %v354_v7, %v333_v8  ;;  %v397_v10 = vpop.f32.mrb[3].mxu1 }
 0x2c5   :  { %338 = vst.msk [vmem:[#allocation2] sm:$0x3] %vm337_vm3, %v334_v9 }
 0x2c6   :  { %494 = shalt.err (!%p491_p4)
}
 0x2c7   :  { %s495_s23 = scalar_lea.hbm %s821_s6, 32 }
 0x2c8   :  { %p496_p5 = scmp.ne.s32.totalorder %s821_s6, %s495_s23  ;;  %p499_p6 = scmp.lt.u32.totalorder %s495_s23, %s821_s6 }
 0x2ca   :  { %p501_p7 = pnand %p499_p6, %p496_p5 }
 0x2cc   :  { %504 = shalt.err (!%p501_p7)
}
 0x2cd   :  { %348 = dma.vmem_to_hbm [thread:$0]  %s346_s20, 32, %s821_s6, [#allocation3]  }
 0x2ce   :  { %505 = dma.done.wait [#allocation3], 32  }
 0x2cf   :  { %506 = vsyncadd [#allocation3], 4294967264 }
 0x2d0   :  { %352 = vsyncpa [#allocation3], 1 }

</bundles_post_ra>
